<compile_context>
chip_gen: v7x
topology: tpu7x:2x2x1
jax: 0.10.0
libtpu: 0.0.40
codegen_flags: <defaults>
</compile_context>

<pallas_src>
import numpy as np

import jax
import jax.numpy as jnp
from jax.experimental import pallas as pl
from jax.experimental.pallas import tpu as pltpu

IN_FEATURES = 256
OUT_FEATURES = 256


# ----------------------------------------------------------------------------
# Kernel: one batch tile of ReLU(x @ W_eff + b_eff)
# ----------------------------------------------------------------------------
def _lm_predictor_kernel(x_ref, w_ref, b_ref, o_ref):
    h = jnp.dot(x_ref[...], w_ref[...], preferred_element_type=jnp.float32)
    h = h + b_ref[...]
    o_ref[...] = jnp.maximum(h, 0.0).astype(o_ref.dtype)


def _round_up(n, m):
    return ((n + m - 1) // m) * m


def lm_predictor(x, w_eff, b_eff, *, block_m=None):
    """x: (B, 256) f32.  w_eff: (256, 256) f32.  b_eff: (1, 256) f32."""
    B = x.shape[0]
    if block_m is None:
        # Large batches: 256-row tiles (well past the 128/256-wide MXU and big
        # enough to amortize the ~0.35us per-step overhead).  Small batches:
        # one tile rounded up to the sublane multiple of 8.
        block_m = 256 if B >= 256 else _round_up(max(B, 1), 8)
    block_m = max(8, _round_up(block_m, 8))

    b_pad = _round_up(B, block_m)
    if b_pad != B:
        x = jnp.pad(x, ((0, b_pad - B), (0, 0)))

    grid = (b_pad // block_m,)
    out = pl.pallas_call(
        _lm_predictor_kernel,
        out_shape=jax.ShapeDtypeStruct((b_pad, OUT_FEATURES), jnp.float32),
        grid=grid,
        in_specs=[
            # Batch tile of activations: streamed / double-buffered per step.
            pl.BlockSpec((block_m, IN_FEATURES), lambda i: (i, 0)),
            # Folded weight + bias: constant index map -> fetched once,
            # VMEM-resident across all grid steps.
            pl.BlockSpec((IN_FEATURES, OUT_FEATURES), lambda i: (0, 0)),
            pl.BlockSpec((1, OUT_FEATURES), lambda i: (0, 0)),
        ],
        out_specs=pl.BlockSpec((block_m, OUT_FEATURES), lambda i: (i, 0)),
        compiler_params=pltpu.CompilerParams(
            # Batch steps are independent -> shard across v7x's 2 TensorCores.
            dimension_semantics=("parallel",),
            # Explicit budget with headroom for v7x's 64 MiB physical VMEM.
            vmem_limit_bytes=32 * 1024 * 1024,
        ),
    )(x, w_eff, b_eff)
    return out[:B]


# ----------------------------------------------------------------------------
# Host-side parameter construction and affine folding
# ----------------------------------------------------------------------------
def _linear_params(key, fan_in, fan_out):
    # PyTorch Linear default init: U(-1/sqrt(fan_in), 1/sqrt(fan_in)).
    # Weight is stored pre-transposed to (in, out) so y = x @ W + b.
    kw, kb = jax.random.split(key)
    bound = 1.0 / (fan_in ** 0.5)
    w = jax.random.uniform(kw, (fan_in, fan_out), jnp.float32, -bound, bound)
    b = jax.random.uniform(kb, (1, fan_out), jnp.float32, -bound, bound)
    return w, b


def _bn_params(key, num_features, eps=1e-5):
    # Eval-mode BatchNorm1d:  y = x * scale + shift
    #   scale = gamma / sqrt(running_var + eps), shift = beta - mean * scale.
    # (PyTorch init is gamma=1, beta=0, mean=0, var=1; we randomize the stats
    # here so the BN folding is exercised non-trivially, as for a trained net.)
    kg, kb, km, kv = jax.random.split(key, 4)
    gamma = jax.random.uniform(kg, (1, num_features), jnp.float32, 0.5, 1.5)
    beta = jax.random.uniform(kb, (1, num_features), jnp.float32, -0.5, 0.5)
    mean = jax.random.uniform(km, (1, num_features), jnp.float32, -0.5, 0.5)
    var = jax.random.uniform(kv, (1, num_features), jnp.float32, 0.5, 1.5)
    scale = gamma * jax.lax.rsqrt(var + eps)
    shift = beta - mean * scale
    return scale, shift


def make_params(key):
    keys = jax.random.split(key, 8)
    w1, b1 = _linear_params(keys[0], 256, 128)
    s1, t1 = _bn_params(keys[1], 128)
    w2, b2 = _linear_params(keys[2], 128, 64)
    s2, t2 = _bn_params(keys[3], 64)
    w3, b3 = _linear_params(keys[4], 64, 64)
    w4, b4 = _linear_params(keys[5], 64, 128)
    s4, t4 = _bn_params(keys[6], 128)
    w5, b5 = _linear_params(keys[7], 128, 256)
    return (w1, b1, s1, t1, w2, b2, s2, t2, w3, b3, w4, b4, s4, t4, w5, b5)


def fold_params(params):
    """Compose all eval-mode layers (Linear / BN-affine / Dropout=identity)
    into a single (W_eff, b_eff).  Done once on the host in float64."""
    p = [np.asarray(a, dtype=np.float64) for a in params]
    (w1, b1, s1, t1, w2, b2, s2, t2, w3, b3, w4, b4, s4, t4, w5, b5) = p

    W = np.eye(IN_FEATURES, dtype=np.float64)
    b = np.zeros((1, IN_FEATURES), dtype=np.float64)

    def lin(W, b, wi, bi):      # y = x @ wi + bi
        return W @ wi, b @ wi + bi

    def aff(W, b, s, t):        # y = x * s + t  (eval-mode BatchNorm1d)
        return W * s, b * s + t

    W, b = lin(W, b, w1, b1); W, b = aff(W, b, s1, t1)
    W, b = lin(W, b, w2, b2); W, b = aff(W, b, s2, t2)
    W, b = lin(W, b, w3, b3)                    # Dropout(p=0.1): identity (eval)
    W, b = lin(W, b, w4, b4); W, b = aff(W, b, s4, t4)
    W, b = lin(W, b, w5, b5)
    return jnp.asarray(W, jnp.float32), jnp.asarray(b, jnp.float32)


def reference_f64(x, params):
    """Layer-by-layer float64 reference of the eval-mode forward pass."""
    p = [np.asarray(a, dtype=np.float64) for a in params]
    (w1, b1, s1, t1, w2, b2, s2, t2, w3, b3, w4, b4, s4, t4, w5, b5) = p
    h = np.asarray(x, dtype=np.float64)
    h = h @ w1 + b1; h = h * s1 + t1
    h = h @ w2 + b2; h = h * s2 + t2
    h = h @ w3 + b3                              # dropout = identity (eval)
    h = h @ w4 + b4; h = h * s4 + t4
    h = h @ w5 + b5
    return np.maximum(h, 0.0)


if __name__ == "__main__":
    key = jax.random.PRNGKey(0)
    k_x, k_p = jax.random.split(key)

    batch = 24
    x = jax.random.normal(k_x, (batch, IN_FEATURES), jnp.float32)
    params = make_params(k_p)
    w_eff, b_eff = fold_params(params)

    # Default path: one batch tile, single grid step.
    out = jax.block_until_ready(lm_predictor(x, w_eff, b_eff))

    # Explicit small tile: exercises multi-step grid + batch padding
    # (B=20 -> padded to 24, grid=(3,) with block_m=8).
    out_tiled = jax.block_until_ready(lm_predictor(x[:20], w_eff, b_eff, block_m=8))

    ref = reference_f64(x, params)
    assert out.shape == (batch, OUT_FEATURES)
    assert np.allclose(np.asarray(out), ref, rtol=1e-4, atol=1e-4), \
        "kernel mismatch vs layer-by-layer reference"
    assert np.allclose(np.asarray(out_tiled), ref[:20], rtol=1e-4, atol=1e-4), \
        "tiled-grid kernel mismatch vs layer-by-layer reference"
    print("KERNEL_OK")
</pallas_src>

<mosaic_0001>
module attributes {stable_mosaic.version = 11 : i64} {
  func.func @_lm_predictor_kernel(%arg0: i32, %arg1: memref<24x256xf32, #tpu.memory_space<vmem>>, %arg2: memref<256x256xf32, #tpu.memory_space<vmem>>, %arg3: memref<1x256xf32, #tpu.memory_space<vmem>>, %arg4: memref<24x256xf32, #tpu.memory_space<vmem>>) attributes {dimension_semantics = [#tpu.dimension_semantics<parallel>], iteration_bounds = array<i64: 1>, scalar_prefetch = 0 : i64, scratch_operands = 0 : i64, tpu.core_type = #tpu.core_type<tc>, window_params = [{transform_indices = @transform_0, window_bounds = array<i64: 24, 256>}, {pipeline_mode = #tpu.pipeline_mode<synchronous>, transform_indices = @transform_1, window_bounds = array<i64: 256, 256>}, {pipeline_mode = #tpu.pipeline_mode<synchronous>, transform_indices = @transform_2, window_bounds = array<i64: 1, 256>}, {transform_indices = @transform_3, window_bounds = array<i64: 24, 256>}]} {
    %c0 = arith.constant 0 : index
    %c0_0 = arith.constant 0 : index
    %0 = vector.load %arg1[%c0, %c0_0] : memref<24x256xf32, #tpu.memory_space<vmem>>, vector<24x256xf32>
    %c0_1 = arith.constant 0 : index
    %c0_2 = arith.constant 0 : index
    %1 = vector.load %arg2[%c0_1, %c0_2] : memref<256x256xf32, #tpu.memory_space<vmem>>, vector<256x256xf32>
    %cst = arith.constant dense<0.000000e+00> : vector<24x256xf32>
    %2 = tpu.matmul %0, %1, %cst {dimension_numbers = #tpu.dot_dimension_numbers<[1], [0], [0], [1], [0, 0, 1, 1], [], []>} : vector<24x256xf32>, vector<256x256xf32>, vector<24x256xf32> -> vector<24x256xf32>
    %c0_3 = arith.constant 0 : index
    %c0_4 = arith.constant 0 : index
    %3 = vector.load %arg3[%c0_3, %c0_4] : memref<1x256xf32, #tpu.memory_space<vmem>>, vector<1x256xf32>
    %4 = vector.broadcast %3 : vector<1x256xf32> to vector<24x256xf32>
    %5 = arith.addf %2, %4 : vector<24x256xf32>
    %cst_5 = arith.constant 0.000000e+00 : f32
    %6 = vector.broadcast %cst_5 : f32 to vector<24x256xf32>
    %7 = arith.maximumf %5, %6 : vector<24x256xf32>
    %c0_6 = arith.constant 0 : index
    %c0_7 = arith.constant 0 : index
    %8 = vector.load %arg4[%c0_6, %c0_7] : memref<24x256xf32, #tpu.memory_space<vmem>>, vector<24x256xf32>
    tpu.vector_store %arg4[%c0_6, %c0_7], %7 {strides = array<i32>} : memref<24x256xf32, #tpu.memory_space<vmem>>, vector<24x256xf32>,
    return
  }
  func.func @transform_0(%arg0: i32) -> (i32, i32) {
    %c0_i32 = arith.constant 0 : i32
    %c0_i32_0 = arith.constant 0 : i32
    return %arg0, %c0_i32 : i32, i32
  }
  func.func @transform_1(%arg0: i32) -> (i32, i32) {
    %c0_i32 = arith.constant 0 : i32
    %c0_i32_0 = arith.constant 0 : i32
    %c0_i32_1 = arith.constant 0 : i32
    return %c0_i32, %c0_i32_0 : i32, i32
  }
  func.func @transform_2(%arg0: i32) -> (i32, i32) {
    %c0_i32 = arith.constant 0 : i32
    %c0_i32_0 = arith.constant 0 : i32
    %c0_i32_1 = arith.constant 0 : i32
    return %c0_i32, %c0_i32_0 : i32, i32
  }
  func.func @transform_3(%arg0: i32) -> (i32, i32) {
    %c0_i32 = arith.constant 0 : i32
    %c0_i32_0 = arith.constant 0 : i32
    return %arg0, %c0_i32 : i32, i32
  }
}

</mosaic_0001>

<bundles_post_ra>
// kernel: tpu_custom_call.1
= control target key start
LH: loop header
LB: loop body
LE: loop exit
PB: predicated region body
PF: predicated region fallthrough
CT: control target
= control target key end

     0   :  { %8 = vsyncpa [#allocation3], 0  ;;  %s484_s0 = inlined_call_operand.hbm [shape: f32[24,256], index: 0, kind: input, shape index: {}]   ;;  %s485_s1 = inlined_call_operand.hbm [shape: f32[256,256], index: 1, kind: input, shape index: {}]   ;;  %s486_s2 = inlined_call_operand.vmem [shape: f32[1,256], index: 2, kind: input, shape index: {}]   ;;  %s487_s3 = inlined_call_operand.hbm [shape: f32[24,256], index: 3, kind: output, shape index: {}]  }
   0x1   :  { %9 = vsyncpa [#allocation6], 0 }
   0x2   :  { %10 = vsyncpa [#allocation4], 0  ;;  %s411_s12 = smov [#allocation2]   ;;  %s339_s16 = scalar_lea.hbm %s484_s0, 768 }
   0x3   :  { %s16_s13 = sshll.u32 %s411_s12, 4  ;;  %p340_p0 = scmp.ne.s32.totalorder %s484_s0, %s339_s16  ;;  %s17_s13 = int_to_ptr.vmem [resolvable:$true] %s16_s13 }
   0x4   :  { %p343_p1 = scmp.lt.u32.totalorder %s339_s16, %s484_s0 }
   0x6   :  { %p345_p2 = pnand %p343_p1, %p340_p0 }
   0x8   :  { %348 = shalt.err (!%p345_p2)
}
   0x9   :  { %s349_s21 = scalar_lea.vmem %s17_s13, 768  ;;  %p354_p4 = scmp.lt.s32.totalorder %s17_s13, %s17_s13 }
   0xa   :  { %p350_p3 = scmp.ne.s32.totalorder %s17_s13, %s349_s21  ;;  %p355_p5 = scmp.lt.s32.totalorder %s349_s21, %s349_s21 }
   0xc   :  { %p356_p6 = por %p355_p5, %p354_p4 }
   0xe   :  { %p357_p7 = pnand %p356_p6, %p350_p3 }
  0x10   :  { %360 = shalt.err (!%p357_p7)
}
  0x11   :  { %s412_s22 = smov 256   ;;  %s413_s23 = smov 16  }
  0x12   :  { %22 = dma.hbm_to_vmem [thread:$0]  %s484_s0, 768, %s17_s13, [#allocation3], %s412_s22, %s412_s22, %s413_s23  }
  0x13   :  { %s414_s26 = smov [#allocation5]   ;;  %s361_s30 = scalar_lea.hbm %s485_s1, 8192 }
  0x14   :  { %s28_s27 = sshll.u32 %s414_s26, 4  ;;  %p362_p8 = scmp.ne.s32.totalorder %s485_s1, %s361_s30  ;;  %s29_s27 = int_to_ptr.vmem [resolvable:$true] %s28_s27 }
  0x15   :  { %p365_p9 = scmp.lt.u32.totalorder %s361_s30, %s485_s1 }
  0x17   :  { %p367_p10 = pnand %p365_p9, %p362_p8 }
  0x19   :  { %370 = shalt.err (!%p367_p10)
}
  0x1a   :  { %s371_s8 = scalar_lea.vmem %s29_s27, 8192  ;;  %p376_p12 = scmp.lt.s32.totalorder %s29_s27, %s29_s27 }
  0x1b   :  { %p372_p11 = scmp.ne.s32.totalorder %s29_s27, %s371_s8  ;;  %p377_p13 = scmp.lt.s32.totalorder %s371_s8, %s371_s8 }
  0x1d   :  { %p378_p0 = por %p377_p13, %p376_p12 }
  0x1f   :  { %p379_p1 = pnand %p378_p0, %p372_p11 }
  0x21   :  { %382 = shalt.err (!%p379_p1)
}
  0x22   :  { %34 = dma.hbm_to_vmem [thread:$0]  %s485_s1, 8192, %s29_s27, [#allocation6], %s412_s22, %s412_s22, %s413_s23  }
  0x23   :  { %405 = dma.done.wait [#allocation3], 768  }
  0x24   :  { %406 = vsyncadd [#allocation3], 4294966528 }
  0x25   :  { %407 = dma.done.wait [#allocation6], 8192  }
  0x26   :  { %408 = vsyncadd [#allocation6], 4294959104  ;;  %v50_v0 = vld [vmem:[#allocation5 + $0x8] sm:$0xff]  ;;  %v52_v1 = vld [vmem:[#allocation5 + $0x18] sm:$0xff] }
  0x27   :  { %v49_v2 = vld [vmem:[#allocation5] sm:$0xff]  ;;  %v238_v3 = vpack.c.bf16 %v52_v1, %v50_v0  ;;  %v51_v4 = vld [vmem:[#allocation5 + $0x10] sm:$0xff]  ;;  %v54_v5 = vld [vmem:[#allocation5 + $0x28] sm:$0xff] }
  0x28   :  { %v56_v6 = vld [vmem:[#allocation5 + $0x38] sm:$0xff]  ;;  %v240_v7 = vpack.c.bf16 %v51_v4, %v49_v2  ;;  %v53_v9 = vld [vmem:[#allocation5 + $0x20] sm:$0xff]  ;;  %v55_v10 = vld [vmem:[#allocation5 + $0x30] sm:$0xff] }
  0x29   :  { %v242_v8 = vpack.c.bf16 %v56_v6, %v54_v5  ;;  %v58_v11 = vld [vmem:[#allocation5 + $0x48] sm:$0xff]  ;;  %302 = vmatprep.subr.bf16.mxu1 %v238_v3  ;;  %239 = vmatprep.subr.bf16.mxu0 %v238_v3  ;;  %v60_v12 = vld [vmem:[#allocation5 + $0x58] sm:$0xff]  ;;  %v244_v13 = vpack.c.bf16 %v55_v10, %v53_v9  ;;  %v57_v15 = vld [vmem:[#allocation5 + $0x40] sm:$0xff] }
  0x2a   :  { %318 = vmatpush1.bf16.msra.mxu1 %v240_v7  ;;  %241 = vmatpush1.bf16.msra.mxu0 %v240_v7  ;;  %v246_v14 = vpack.c.bf16 %v60_v12, %v58_v11  ;;  %v59_v16 = vld [vmem:[#allocation5 + $0x50] sm:$0xff]  ;;  %v62_v17 = vld [vmem:[#allocation5 + $0x68] sm:$0xff]  ;;  %v64_v18 = vld [vmem:[#allocation5 + $0x78] sm:$0xff] }
  0x2b   :  { %303 = vmatprep.subr.bf16.mxu1 %v242_v8  ;;  %243 = vmatprep.subr.bf16.mxu0 %v242_v8  ;;  %v248_v19 = vpack.c.bf16 %v59_v16, %v57_v15  ;;  %v250_v20 = vpack.c.bf16 %v64_v18, %v62_v17  ;;  %v61_v21 = vld [vmem:[#allocation5 + $0x60] sm:$0xff]  ;;  %v63_v22 = vld [vmem:[#allocation5 + $0x70] sm:$0xff]  ;;  %v66_v23 = vld [vmem:[#allocation5 + $0x88] sm:$0xff] }
  0x2c   :  { %v68_v24 = vld [vmem:[#allocation5 + $0x98] sm:$0xff]  ;;  %v252_v25 = vpack.c.bf16 %v63_v22, %v61_v21  ;;  %v65_v27 = vld [vmem:[#allocation5 + $0x80] sm:$0xff]  ;;  %v67_v28 = vld [vmem:[#allocation5 + $0x90] sm:$0xff] }
  0x2d   :  { %v254_v26 = vpack.c.bf16 %v68_v24, %v66_v23  ;;  %v70_v29 = vld [vmem:[#allocation5 + $0xa8] sm:$0xff]  ;;  %v72_v30 = vld [vmem:[#allocation5 + $0xb8] sm:$0xff]  ;;  %v256_v31 = vpack.c.bf16 %v67_v28, %v65_v27  ;;  %v69_v33 = vld [vmem:[#allocation5 + $0xa0] sm:$0xff] }
  0x2e   :  { %319 = vmatpush1.bf16.msra.mxu1 %v244_v13  ;;  %245 = vmatpush1.bf16.msra.mxu0 %v244_v13  ;;  %v258_v32 = vpack.c.bf16 %v72_v30, %v70_v29  ;;  %v71_v34 = vld [vmem:[#allocation5 + $0xb0] sm:$0xff]  ;;  %v74_v35 = vld [vmem:[#allocation5 + $0xc8] sm:$0xff]  ;;  %v76_v36 = vld [vmem:[#allocation5 + $0xd8] sm:$0xff] }
  0x2f   :  { %304 = vmatprep.subr.bf16.mxu1 %v246_v14  ;;  %247 = vmatprep.subr.bf16.mxu0 %v246_v14  ;;  %v260_v37 = vpack.c.bf16 %v71_v34, %v69_v33  ;;  %v262_v38 = vpack.c.bf16 %v76_v36, %v74_v35  ;;  %v73_v39 = vld [vmem:[#allocation5 + $0xc0] sm:$0xff]  ;;  %v75_v40 = vld [vmem:[#allocation5 + $0xd0] sm:$0xff]  ;;  %v46_v41 = vld [vmem:[#allocation2 + $0x18] sm:$0xff] }
  0x30   :  { %v78_v42 = vld [vmem:[#allocation5 + $0xe8] sm:$0xff]  ;;  %v80_v43 = vld [vmem:[#allocation5 + $0xf8] sm:$0xff]  ;;  %195 = vmatprep.mubr.f32.mxu1 %v46_v41  ;;  %v264_v45 = vpack.c.bf16 %v75_v40, %v73_v39  ;;  %v77_v47 = vld [vmem:[#allocation5 + $0xe0] sm:$0xff] }
  0x31   :  { %v44_v44 = vld [vmem:[#allocation2 + $0x8] sm:$0xff]  ;;  %v266_v46 = vpack.c.bf16 %v80_v43, %v78_v42  ;;  %v79_v48 = vld [vmem:[#allocation5 + $0xf0] sm:$0xff]  ;;  %v82_v49 = vld [vmem:[#allocation5 + $0x108] sm:$0xff] }
  0x32   :  { %320 = vmatpush1.bf16.msra.mxu1 %v248_v19  ;;  %249 = vmatpush1.bf16.msra.mxu0 %v248_v19  ;;  %v84_v50 = vld [vmem:[#allocation5 + $0x118] sm:$0xff]  ;;  %v268_v51 = vpack.c.bf16 %v79_v48, %v77_v47  ;;  %v81_v53 = vld [vmem:[#allocation5 + $0x100] sm:$0xff]  ;;  %v83_v54 = vld [vmem:[#allocation5 + $0x110] sm:$0xff] }
  0x33   :  { %305 = vmatprep.subr.bf16.mxu1 %v250_v20  ;;  %251 = vmatprep.subr.bf16.mxu0 %v250_v20  ;;  %v270_v52 = vpack.c.bf16 %v84_v50, %v82_v49  ;;  %v86_v55 = vld [vmem:[#allocation5 + $0x128] sm:$0xff]  ;;  %v88_v56 = vld [vmem:[#allocation5 + $0x138] sm:$0xff]  ;;  %v272_v57 = vpack.c.bf16 %v83_v54, %v81_v53  ;;  %v85_v59 = vld [vmem:[#allocation5 + $0x120] sm:$0xff] }
  0x34   :  { %189 = vmatprep.mubr.f32.mxu0 %v44_v44  ;;  %v274_v58 = vpack.c.bf16 %v88_v56, %v86_v55  ;;  %v87_v60 = vld [vmem:[#allocation5 + $0x130] sm:$0xff]  ;;  %v90_v61 = vld [vmem:[#allocation5 + $0x148] sm:$0xff]  ;;  %v92_v62 = vld [vmem:[#allocation5 + $0x158] sm:$0xff] }
  0x35   :  { %v276_v63 = vpack.c.bf16 %v87_v60, %v85_v59  ;;  %v278_v0 = vpack.c.bf16 %v92_v62, %v90_v61  ;;  %v89_v1 = vld [vmem:[#allocation5 + $0x140] sm:$0xff]  ;;  %v91_v2 = vld [vmem:[#allocation5 + $0x150] sm:$0xff]  ;;  %v94_v3 = vld [vmem:[#allocation5 + $0x168] sm:$0xff] }
  0x36   :  { %321 = vmatpush1.bf16.msra.mxu1 %v252_v25  ;;  %253 = vmatpush1.bf16.msra.mxu0 %v252_v25  ;;  %v96_v4 = vld [vmem:[#allocation5 + $0x178] sm:$0xff]  ;;  %v280_v5 = vpack.c.bf16 %v91_v2, %v89_v1  ;;  %v93_v7 = vld [vmem:[#allocation5 + $0x160] sm:$0xff]  ;;  %v95_v8 = vld [vmem:[#allocation5 + $0x170] sm:$0xff] }
  0x37   :  { %306 = vmatprep.subr.bf16.mxu1 %v254_v26  ;;  %255 = vmatprep.subr.bf16.mxu0 %v254_v26  ;;  %v282_v6 = vpack.c.bf16 %v96_v4, %v94_v3  ;;  %v98_v9 = vld [vmem:[#allocation5 + $0x188] sm:$0xff]  ;;  %v100_v10 = vld [vmem:[#allocation5 + $0x198] sm:$0xff]  ;;  %v284_v11 = vpack.c.bf16 %v95_v8, %v93_v7  ;;  %v97_v13 = vld [vmem:[#allocation5 + $0x180] sm:$0xff] }
  0x38   :  { %v286_v12 = vpack.c.bf16 %v100_v10, %v98_v9  ;;  %v99_v14 = vld [vmem:[#allocation5 + $0x190] sm:$0xff]  ;;  %v102_v15 = vld [vmem:[#allocation5 + $0x1a8] sm:$0xff]  ;;  %v104_v16 = vld [vmem:[#allocation5 + $0x1b8] sm:$0xff] }
  0x39   :  { %v288_v17 = vpack.c.bf16 %v99_v14, %v97_v13  ;;  %v290_v18 = vpack.c.bf16 %v104_v16, %v102_v15  ;;  %v101_v19 = vld [vmem:[#allocation5 + $0x1a0] sm:$0xff]  ;;  %v103_v20 = vld [vmem:[#allocation5 + $0x1b0] sm:$0xff]  ;;  %v106_v21 = vld [vmem:[#allocation5 + $0x1c8] sm:$0xff] }
  0x3a   :  { %322 = vmatpush1.bf16.msra.mxu1 %v256_v31  ;;  %257 = vmatpush1.bf16.msra.mxu0 %v256_v31  ;;  %v108_v22 = vld [vmem:[#allocation5 + $0x1d8] sm:$0xff]  ;;  %v292_v23 = vpack.c.bf16 %v103_v20, %v101_v19  ;;  %v105_v25 = vld [vmem:[#allocation5 + $0x1c0] sm:$0xff]  ;;  %v107_v26 = vld [vmem:[#allocation5 + $0x1d0] sm:$0xff] }
  0x3b   :  { %307 = vmatprep.subr.bf16.mxu1 %v258_v32  ;;  %259 = vmatprep.subr.bf16.mxu0 %v258_v32  ;;  %v294_v24 = vpack.c.bf16 %v108_v22, %v106_v21  ;;  %v110_v27 = vld [vmem:[#allocation5 + $0x1e8] sm:$0xff]  ;;  %v112_v28 = vld [vmem:[#allocation5 + $0x1f8] sm:$0xff]  ;;  %v296_v29 = vpack.c.bf16 %v107_v26, %v105_v25  ;;  %v109_v31 = vld [vmem:[#allocation5 + $0x1e0] sm:$0xff] }
  0x3c   :  { %v298_v30 = vpack.c.bf16 %v112_v28, %v110_v27  ;;  %v111_v32 = vld [vmem:[#allocation5 + $0x1f0] sm:$0xff]  ;;  %v45_v34 = vld [vmem:[#allocation2 + $0x10] sm:$0xff]  ;;  %v48_v36 = vld [vmem:[#allocation2 + $0x28] sm:$0xff] }
  0x3d   :  { %v300_v33 = vpack.c.bf16 %v111_v32, %v109_v31  ;;  %v43_v35 = vld [vmem:[#allocation2] sm:$0xff] }
  0x3e   :  { %323 = vmatpush1.bf16.msra.mxu1 %v260_v37  ;;  %261 = vmatpush1.bf16.msra.mxu0 %v260_v37  ;;  %v47_v37 = vld [vmem:[#allocation2 + $0x20] sm:$0xff] }
  0x3f   :  { %308 = vmatprep.subr.bf16.mxu1 %v262_v38  ;;  %263 = vmatprep.subr.bf16.mxu0 %v262_v38  ;;  %v115_v38 = vlaneseq  ;;  %v113_v41 = vld [vmem:[%s486_s2] sm:$0x3]  ;;  %s415_s2 = smov [#allocation7]  }
  0x40   :  { %s225_s11 = sshll.u32 %s415_s2, 4  ;;  %s226_s11 = int_to_ptr.vmem [resolvable:$true] %s225_s11 }
  0x41   :  { %v116_v39 = vshrl.u32 %v115_v38, 7  ;;  %s383_s12 = scalar_lea.vmem %s226_s11, 768  ;;  %p388_p3 = scmp.lt.s32.totalorder %s226_s11, %s226_s11 }
  0x42   :  { %324 = vmatpush1.bf16.msra.mxu1 %v264_v45  ;;  %265 = vmatpush1.bf16.msra.mxu0 %v264_v45  ;;  %p384_p2 = scmp.ne.s32.totalorder %s226_s11, %s383_s12  ;;  %p389_p4 = scmp.lt.s32.totalorder %s383_s12, %s383_s12 }
  0x43   :  { %309 = vmatprep.subr.bf16.mxu1 %v266_v46  ;;  %267 = vmatprep.subr.bf16.mxu0 %v266_v46  ;;  %v117_v40 = vsub.s32 0, %v116_v39  ;;  %v121_v42 = vsub.s32 1, %v116_v39 }
  0x44   :  { %p390_p5 = por %p389_p4, %p388_p3 }
  0x45   :  { %v118_v43 = vrot.slane %v113_v41, %v117_v40  ;;  %v122_v44 = vrot.slane %v113_v41, %v121_v42 }
  0x46   :  { %325 = vmatpush1.bf16.msra.mxu1 %v268_v51  ;;  %269 = vmatpush1.bf16.msra.mxu0 %v268_v51  ;;  %p391_p6 = pnand %p390_p5, %p384_p2 }
  0x47   :  { %310 = vmatprep.subr.bf16.mxu1 %v270_v52  ;;  %271 = vmatprep.subr.bf16.mxu0 %v270_v52 }
  0x4a   :  { %326 = vmatpush1.bf16.msra.mxu1 %v272_v57  ;;  %273 = vmatpush1.bf16.msra.mxu0 %v272_v57 }
  0x4b   :  { %311 = vmatprep.subr.bf16.mxu1 %v274_v58  ;;  %275 = vmatprep.subr.bf16.mxu0 %v274_v58 }
  0x4e   :  { %327 = vmatpush1.bf16.msra.mxu1 %v276_v63  ;;  %277 = vmatpush1.bf16.msra.mxu0 %v276_v63 }
  0x4f   :  { %312 = vmatprep.subr.bf16.mxu1 %v278_v0  ;;  %279 = vmatprep.subr.bf16.mxu0 %v278_v0 }
  0x52   :  { %328 = vmatpush1.bf16.msra.mxu1 %v280_v5  ;;  %281 = vmatpush1.bf16.msra.mxu0 %v280_v5 }
  0x53   :  { %313 = vmatprep.subr.bf16.mxu1 %v282_v6  ;;  %283 = vmatprep.subr.bf16.mxu0 %v282_v6 }
  0x56   :  { %329 = vmatpush1.bf16.msra.mxu1 %v284_v11  ;;  %285 = vmatpush1.bf16.msra.mxu0 %v284_v11 }
  0x57   :  { %314 = vmatprep.subr.bf16.mxu1 %v286_v12  ;;  %287 = vmatprep.subr.bf16.mxu0 %v286_v12 }
  0x5a   :  { %330 = vmatpush1.bf16.msra.mxu1 %v288_v17  ;;  %289 = vmatpush1.bf16.msra.mxu0 %v288_v17 }
  0x5b   :  { %315 = vmatprep.subr.bf16.mxu1 %v290_v18  ;;  %291 = vmatprep.subr.bf16.mxu0 %v290_v18 }
  0x5e   :  { %331 = vmatpush1.bf16.msra.mxu1 %v292_v23  ;;  %293 = vmatpush1.bf16.msra.mxu0 %v292_v23 }
  0x5f   :  { %316 = vmatprep.subr.bf16.mxu1 %v294_v24  ;;  %295 = vmatprep.subr.bf16.mxu0 %v294_v24 }
  0x62   :  { %332 = vmatpush1.bf16.msra.mxu1 %v296_v29  ;;  %297 = vmatpush1.bf16.msra.mxu0 %v296_v29 }
  0x63   :  { %317 = vmatprep.subr.bf16.mxu1 %v298_v30  ;;  %299 = vmatprep.subr.bf16.mxu0 %v298_v30 }
  0x66   :  { %333 = vmatpush1.bf16.msra.mxu1 %v300_v33  ;;  %301 = vmatpush1.bf16.msra.mxu0 %v300_v33 }
  0x69   :  { %196 = vmatmul.mubr.f32.vlgmr.msra.gmra.mrb[0].mxu1 %v45_v34  ;;  %190 = vmatmul.mubr.f32.vlgmr.msra.gmra.mrb[0].mxu0 %v43_v35 }
  0x6a   :  { %201 = vmatprep.mubr.f32.mxu1 %v48_v36 }
  0x6d   :  { %202 = vmatmul.mubr.f32.gmra.mrb[2].mxu1 %v47_v37 }
 0x13c   :  { %v197_v45 = vpop.f32.mrb[0].mxu1  ;;  %v191_v46 = vpop.f32.mrb[0].mxu0 }
 0x13d   :  { %v198_v47 = vadd.f32 %v197_v45, %v118_v43  ;;  %v199_v48 = vpop.f32.mrb[1].mxu1  ;;  %v192_v49 = vadd.f32 %v191_v46, %v118_v43  ;;  %v193_v50 = vpop.f32.mrb[1].mxu0 }
 0x13e   :  { %v200_v51 = vadd.f32 %v199_v48, %v122_v44  ;;  %v194_v52 = vadd.f32 %v193_v50, %v122_v44 }
 0x13f   :  { %v210_v53 = vmax.f32 %v198_v47, 0.0  ;;  %v208_v54 = vmax.f32 %v192_v49, 0.0 }
 0x140   :  { %v211_v55 = vmax.f32 %v200_v51, 0.0  ;;  %v209_v56 = vmax.f32 %v194_v52, 0.0  ;;  %v203_v57 = vpop.f32.mrb[2].mxu1 }
 0x141   :  { %216 = vst [vmem:[#allocation7 + $0x10] sm:$0xff] %v210_v53  ;;  %214 = vst [vmem:[#allocation7] sm:$0xff] %v208_v54  ;;  %v204_v58 = vadd.f32 %v203_v57, %v118_v43  ;;  %v205_v59 = vpop.f32.mrb[3].mxu1 }
 0x142   :  { %217 = vst [vmem:[#allocation7 + $0x18] sm:$0xff] %v211_v55  ;;  %215 = vst [vmem:[#allocation7 + $0x8] sm:$0xff] %v209_v56  ;;  %v206_v60 = vadd.f32 %v205_v59, %v122_v44 }
 0x143   :  { %v212_v61 = vmax.f32 %v204_v58, 0.0 }
 0x144   :  { %v213_v62 = vmax.f32 %v206_v60, 0.0 }
 0x145   :  { %218 = vst [vmem:[#allocation7 + $0x20] sm:$0xff] %v212_v61 }
 0x146   :  { %219 = vst [vmem:[#allocation7 + $0x28] sm:$0xff] %v213_v62 }
 0x147   :  { %394 = shalt.err (!%p391_p6)
}
 0x148   :  { %s395_s15 = scalar_lea.hbm %s487_s3, 768 }
 0x149   :  { %p396_p7 = scmp.ne.s32.totalorder %s487_s3, %s395_s15  ;;  %p399_p8 = scmp.lt.u32.totalorder %s395_s15, %s487_s3 }
 0x14b   :  { %p401_p9 = pnand %p399_p8, %p396_p7 }
 0x14d   :  { %404 = shalt.err (!%p401_p9)
}
 0x14e   :  { %231 = dma.vmem_to_hbm [thread:$0]  %s226_s11, 768, %s487_s3, [#allocation4], %s412_s22, %s412_s22, %s413_s23  }
 0x14f   :  { %409 = dma.done.wait [#allocation4], 768  }
 0x150   :  { %410 = vsyncadd [#allocation4], 4294966528 }
 0x151   :  { %235 = vsyncpa [#allocation3], 1 }
 0x152   :  { %236 = vsyncpa [#allocation6], 1 }
 0x153   :  { %237 = vsyncpa [#allocation4], 1 }

</bundles_post_ra>
